<compile_context>
chip_gen: v7x
topology: tpu7x:2x2x1
jax: 0.10.0
libtpu: 0.0.40
codegen_flags: <defaults>
</compile_context>

<pallas_src>
from functools import partial

import jax
import jax.numpy as jnp
from jax.experimental import pallas as pl
from jax.experimental.pallas import tpu as pltpu


# ---------------------------------------------------------------------------
# one-time weight preprocessing (outside the per-call forward)
# ---------------------------------------------------------------------------
def prepare_attention_params(w_qkv, w_proj, b_proj, num_heads,
                             param_dtype=jnp.bfloat16):
    """Rearrange PyTorch-layout weights for the fused kernel.

      w_qkv : (3C, C)  nn.Linear weight (out, in), rows ordered [q | k | v]
      w_proj: (C, C)   nn.Linear weight (out, in)
      b_proj: (C,)

    Returns:
      wqkv : (C, 3C)  so that x @ wqkv == qkv(x); softmax scale folded into
                      the q columns; cast to bf16.
      wp   : (C, C)   so that ctx @ wp == proj(ctx); cast to bf16.
      b    : (1, C)   f32 proj bias.
    """
    three_c, C = w_qkv.shape
    assert three_c == 3 * C and C % num_heads == 0
    Dh = C // num_heads
    scale = Dh ** -0.5
    w_qkv_scaled = jnp.concatenate([w_qkv[:C] * scale, w_qkv[C:]], axis=0)
    wqkv = jnp.transpose(w_qkv_scaled).astype(param_dtype)   # (C, 3C)
    wp = jnp.transpose(w_proj).astype(param_dtype)           # (C, C)
    b = b_proj.reshape(1, C).astype(jnp.float32)
    return wqkv, wp, b


# ---------------------------------------------------------------------------
# kernel
# ---------------------------------------------------------------------------
def attention_kernel(x_ref, wqkv_ref, wp_ref, b_ref, o_ref, ctx_ref, *,
                     num_heads):
    # x_ref   : (Bt, N, C)   packed batch tile (f32 or bf16)
    # wqkv_ref: (C, 3C)      bf16, softmax scale folded into q columns
    # wp_ref  : (C, C)       bf16
    # b_ref   : (1, C)       f32 proj bias
    # o_ref   : (Bt, N, C)
    # ctx_ref : (Bt*N, C)    bf16 VMEM scratch for the head merge
    Bt, N, C = x_ref.shape
    H = num_heads
    Dh = C // H
    rows = Bt * N
    G = H * Bt                       # leading batch dim of the attention core

    # --- fused q/k/v projection: one lane-dense (rows, C) @ (C, 3C) matmul --
    x2d = x_ref[...].reshape(rows, C).astype(jnp.bfloat16)
    qkv = jnp.dot(x2d, wqkv_ref[...],
                  preferred_element_type=jnp.float32)          # (rows, 3C) f32
    qkv = qkv.astype(jnp.bfloat16)

    # --- split heads: lane slices -> leading head batch (H*Bt, N, Dh) -------
    def split_heads(base):
        hs = [qkv[:, base + h * Dh: base + (h + 1) * Dh] for h in range(H)]
        return jnp.stack(hs, axis=0).reshape(G, N, Dh)         # g = h*Bt + b

    q = split_heads(0 * C)           # already carries the softmax scale
    k = split_heads(1 * C)
    v = split_heads(2 * C)

    def bmm(a, b, ca, cb):
        return jax.lax.dot_general(
            a, b, (((ca,), (cb,)), ((0,), (0,))),
            preferred_element_type=jnp.float32)

    # --- attention core, softmax math in f32 --------------------------------
    s = bmm(q, k, 2, 2)                                        # (G, N, N) f32
    s = s - jnp.max(s, axis=-1, keepdims=True)
    p = jnp.exp(s)
    denom = jnp.sum(p, axis=-1, keepdims=True)                 # (G, N, 1)
    ctx = bmm(p.astype(jnp.bfloat16), v, 2, 1)                 # (G, N, Dh) f32
    # normalise ctx (G,N,Dh) instead of p (G,N,N); exact reciprocal is cheap
    # on the (G,N,1) slab.
    ctx = ctx * pl.reciprocal(denom, approx=False)

    # --- merge heads back into the lane dim: (rows, C) ----------------------
    ctxh = ctx.astype(jnp.bfloat16).reshape(H, rows, Dh)       # (h, b*N+n, d)
    for h in range(H):
        ctx_ref[:, h * Dh:(h + 1) * Dh] = ctxh[h]

    # --- output projection: single matmul with contraction depth K = C ------
    y = jnp.dot(ctx_ref[...], wp_ref[...],
                preferred_element_type=jnp.float32)            # (rows, C) f32
    y = y + b_ref[...]
    o_ref[...] = y.reshape(Bt, N, C).astype(o_ref.dtype)


# ---------------------------------------------------------------------------
# tile / VMEM sizing helpers
# ---------------------------------------------------------------------------
def _vmem_budget_bytes():
    """Scoped VMEM budget derived from the actual chip (64 MiB on v7x,
    128 MiB on v5e/v6e); conservative fallback if the query is unavailable."""
    cap = None
    try:
        cap = int(pltpu.get_tpu_info().vmem_capacity_bytes)
    except Exception:
        cap = None
    if not cap:
        cap = 64 * 1024 * 1024            # assume the smallest (v7x)
    return int(min((cap * 3) // 4, 100 * 1024 * 1024))


def _per_step_vmem_bytes(Bt, N, C, H, x_bytes, out_bytes):
    """Rough upper bound on per-grid-step VMEM use for the kernel above."""
    rows = Bt * N
    G = Bt * H
    total = 0
    total += 2 * rows * C * x_bytes               # double-buffered x blocks
    total += 2 * rows * C * out_bytes             # double-buffered out blocks
    total += 2 * (C * 3 * C + C * C) * 2 + 2 * C * 4   # weights + bias
    total += rows * C * 2                         # x bf16 copy
    total += rows * 3 * C * (4 + 2)               # qkv f32 result + bf16 cast
    total += 3 * rows * C * 2                     # stacked q/k/v (bf16)
    total += G * N * N * (4 + 4 + 2)              # scores f32, exp f32, p bf16
    total += rows * C * 4                         # ctx f32
    total += rows * C * 2                         # ctx merge scratch bf16
    total += rows * C * 4                         # y f32
    return total


def _pick_batch_tile(B, N, C, H, budget_bytes, x_bytes, out_bytes,
                     min_grid=2, max_rows=1024):
    """Largest divisor Bt of B that (a) keeps the grid >= min_grid when B
    allows (v7x has 2 TensorCores), and (b) fits the per-step VMEM budget."""
    best = 1
    for bt in range(1, B + 1):
        if B % bt:
            continue
        if B >= min_grid and B // bt < min_grid:
            continue
        if bt > 1:
            if bt * N > max_rows:
                continue
            if _per_step_vmem_bytes(bt, N, C, H, x_bytes, out_bytes) > budget_bytes:
                continue
        best = bt
    return best


# ---------------------------------------------------------------------------
# wrapper
# ---------------------------------------------------------------------------
def attention_forward(x, params, num_heads, block_b=None, min_grid=2):
    """x: (B, N, C); params: output of prepare_attention_params."""
    wqkv, wp, b = params
    B, N, C = x.shape
    H = num_heads
    assert C % H == 0

    budget = _vmem_budget_bytes()
    x_bytes = jnp.dtype(x.dtype).itemsize
    Bt = (block_b if block_b is not None
          else _pick_batch_tile(B, N, C, H, budget, x_bytes, x_bytes,
                                min_grid=min_grid))
    assert B % Bt == 0
    rows = Bt * N

    kernel = partial(attention_kernel, num_heads=H)

    # NOTE: for best throughput C should be a multiple of 128 (lane-dense
    # output stores); smaller C (as in the toy test) is correct but uses
    # masked partial stores.
    return pl.pallas_call(
        kernel,
        out_shape=jax.ShapeDtypeStruct((B, N, C), x.dtype),
        grid_spec=pltpu.PrefetchScalarGridSpec(
            num_scalar_prefetch=0,
            grid=(B // Bt,),
            in_specs=[
                pl.BlockSpec((Bt, N, C), lambda i: (i, 0, 0)),
                pl.BlockSpec((C, 3 * C), lambda i: (0, 0)),
                pl.BlockSpec((C, C), lambda i: (0, 0)),
                pl.BlockSpec((1, C), lambda i: (0, 0)),
            ],
            out_specs=pl.BlockSpec((Bt, N, C), lambda i: (i, 0, 0)),
            scratch_shapes=[pltpu.VMEM((rows, C), jnp.bfloat16)],
        ),
        compiler_params=pltpu.CompilerParams(
            dimension_semantics=("parallel",),
            vmem_limit_bytes=budget,
        ),
    )(x, wqkv, wp, b)


# ---------------------------------------------------------------------------
# pure-JAX reference (replica of the PyTorch forward) for verification
# ---------------------------------------------------------------------------
def attention_reference(x, w_qkv, w_proj, b_proj, num_heads):
    B, N, C = x.shape
    Dh = C // num_heads
    scale = Dh ** -0.5
    qkv = x @ w_qkv.T                                       # (B, N, 3C)
    qkv = qkv.reshape(B, N, 3, num_heads, Dh).transpose(2, 0, 3, 1, 4)
    q, k, v = qkv[0], qkv[1], qkv[2]                        # (B, H, N, Dh)
    attn = (q @ jnp.swapaxes(k, -2, -1)) * scale
    attn = jax.nn.softmax(attn, axis=-1)
    out = (attn @ v).transpose(0, 2, 1, 3).reshape(B, N, C)
    return out @ w_proj.T + b_proj


if __name__ == "__main__":
    B, N, C = 2, 16, 32
    num_heads = 4

    key = jax.random.PRNGKey(0)
    kx, kqkv, kproj, kb = jax.random.split(key, 4)

    x = jax.random.normal(kx, (B, N, C), dtype=jnp.float32)
    # deterministic synthetic params, PyTorch shapes: Linear weight is (out, in)
    w_qkv = 0.02 * jax.random.normal(kqkv, (3 * C, C), dtype=jnp.float32)
    w_proj = 0.02 * jax.random.normal(kproj, (C, C), dtype=jnp.float32)
    b_proj = 0.02 * jax.random.normal(kb, (C,), dtype=jnp.float32)

    # one-time weight preprocessing (outside the forward path)
    params = prepare_attention_params(w_qkv, w_proj, b_proj, num_heads)
    params = jax.block_until_ready(params)

    out = attention_forward(x, params, num_heads)
    out = jax.block_until_ready(out)

    ref = attention_reference(x, w_qkv, w_proj, b_proj, num_heads)
    assert out.shape == (B, N, C)
    # bf16 MXU operands -> tolerance looser than pure f32
    assert jnp.allclose(out, ref, atol=1e-2, rtol=1e-2), (
        f"max abs err = {jnp.max(jnp.abs(out - ref))}")

    print("KERNEL_OK")
</pallas_src>

<mosaic_0001>
module attributes {stable_mosaic.version = 11 : i64} {
  func.func @attention_kernel(%arg0: i32, %arg1: memref<1x16x32xf32, #tpu.memory_space<vmem>>, %arg2: memref<32x96xbf16, #tpu.memory_space<vmem>>, %arg3: memref<32x32xbf16, #tpu.memory_space<vmem>>, %arg4: memref<1x32xf32, #tpu.memory_space<vmem>>, %arg5: memref<1x16x32xf32, #tpu.memory_space<vmem>>, %arg6: memref<16x32xbf16, #tpu.memory_space<vmem>>) attributes {dimension_semantics = [#tpu.dimension_semantics<parallel>], iteration_bounds = array<i64: 2>, scalar_prefetch = 0 : i64, scratch_operands = 1 : i64, tpu.core_type = #tpu.core_type<tc>, window_params = [{transform_indices = @transform_0, window_bounds = array<i64: 1, 16, 32>}, {pipeline_mode = #tpu.pipeline_mode<synchronous>, transform_indices = @transform_1, window_bounds = array<i64: 32, 96>}, {pipeline_mode = #tpu.pipeline_mode<synchronous>, transform_indices = @transform_2, window_bounds = array<i64: 32, 32>}, {pipeline_mode = #tpu.pipeline_mode<synchronous>, transform_indices = @transform_3, window_bounds = array<i64: 1, 32>}, {transform_indices = @transform_4, window_bounds = array<i64: 1, 16, 32>}]} {
    %c0 = arith.constant 0 : index
    %c0_0 = arith.constant 0 : index
    %c0_1 = arith.constant 0 : index
    %0 = vector.load %arg1[%c0, %c0_0, %c0_1] : memref<1x16x32xf32, #tpu.memory_space<vmem>>, vector<1x16x32xf32>
    %1 = vector.shape_cast %0 : vector<1x16x32xf32> to vector<16x32xf32>
    %2 = arith.truncf %1 : vector<16x32xf32> to vector<16x32xbf16>
    %c0_2 = arith.constant 0 : index
    %c0_3 = arith.constant 0 : index
    %3 = vector.load %arg2[%c0_2, %c0_3] : memref<32x96xbf16, #tpu.memory_space<vmem>>, vector<32x96xbf16>
    %cst = arith.constant dense<0.000000e+00> : vector<16x96xf32>
    %4 = tpu.matmul %2, %3, %cst {dimension_numbers = #tpu.dot_dimension_numbers<[1], [0], [0], [1], [0, 0, 1, 1], [], []>} : vector<16x32xbf16>, vector<32x96xbf16>, vector<16x96xf32> -> vector<16x96xf32>
    %5 = arith.truncf %4 : vector<16x96xf32> to vector<16x96xbf16>
    %6 = vector.extract_strided_slice %5 {offsets = [0, 0], sizes = [16, 8], strides = [1, 1]} : vector<16x96xbf16> to vector<16x8xbf16>
    %7 = vector.extract_strided_slice %5 {offsets = [0, 8], sizes = [16, 8], strides = [1, 1]} : vector<16x96xbf16> to vector<16x8xbf16>
    %8 = vector.extract_strided_slice %5 {offsets = [0, 16], sizes = [16, 8], strides = [1, 1]} : vector<16x96xbf16> to vector<16x8xbf16>
    %9 = vector.extract_strided_slice %5 {offsets = [0, 24], sizes = [16, 8], strides = [1, 1]} : vector<16x96xbf16> to vector<16x8xbf16>
    %10 = vector.shape_cast %6 : vector<16x8xbf16> to vector<1x16x8xbf16>
    %11 = vector.shape_cast %7 : vector<16x8xbf16> to vector<1x16x8xbf16>
    %12 = vector.shape_cast %8 : vector<16x8xbf16> to vector<1x16x8xbf16>
    %13 = vector.shape_cast %9 : vector<16x8xbf16> to vector<1x16x8xbf16>
    %14 = tpu.concatenate %10, %11, %12, %13 in 0 : vector<1x16x8xbf16>, vector<1x16x8xbf16>, vector<1x16x8xbf16>, vector<1x16x8xbf16> -> vector<4x16x8xbf16>
    %15 = vector.extract_strided_slice %5 {offsets = [0, 32], sizes = [16, 8], strides = [1, 1]} : vector<16x96xbf16> to vector<16x8xbf16>
    %16 = vector.extract_strided_slice %5 {offsets = [0, 40], sizes = [16, 8], strides = [1, 1]} : vector<16x96xbf16> to vector<16x8xbf16>
    %17 = vector.extract_strided_slice %5 {offsets = [0, 48], sizes = [16, 8], strides = [1, 1]} : vector<16x96xbf16> to vector<16x8xbf16>
    %18 = vector.extract_strided_slice %5 {offsets = [0, 56], sizes = [16, 8], strides = [1, 1]} : vector<16x96xbf16> to vector<16x8xbf16>
    %19 = vector.shape_cast %15 : vector<16x8xbf16> to vector<1x16x8xbf16>
    %20 = vector.shape_cast %16 : vector<16x8xbf16> to vector<1x16x8xbf16>
    %21 = vector.shape_cast %17 : vector<16x8xbf16> to vector<1x16x8xbf16>
    %22 = vector.shape_cast %18 : vector<16x8xbf16> to vector<1x16x8xbf16>
    %23 = tpu.concatenate %19, %20, %21, %22 in 0 : vector<1x16x8xbf16>, vector<1x16x8xbf16>, vector<1x16x8xbf16>, vector<1x16x8xbf16> -> vector<4x16x8xbf16>
    %24 = vector.extract_strided_slice %5 {offsets = [0, 64], sizes = [16, 8], strides = [1, 1]} : vector<16x96xbf16> to vector<16x8xbf16>
    %25 = vector.extract_strided_slice %5 {offsets = [0, 72], sizes = [16, 8], strides = [1, 1]} : vector<16x96xbf16> to vector<16x8xbf16>
    %26 = vector.extract_strided_slice %5 {offsets = [0, 80], sizes = [16, 8], strides = [1, 1]} : vector<16x96xbf16> to vector<16x8xbf16>
    %27 = vector.extract_strided_slice %5 {offsets = [0, 88], sizes = [16, 8], strides = [1, 1]} : vector<16x96xbf16> to vector<16x8xbf16>
    %28 = vector.shape_cast %24 : vector<16x8xbf16> to vector<1x16x8xbf16>
    %29 = vector.shape_cast %25 : vector<16x8xbf16> to vector<1x16x8xbf16>
    %30 = vector.shape_cast %26 : vector<16x8xbf16> to vector<1x16x8xbf16>
    %31 = vector.shape_cast %27 : vector<16x8xbf16> to vector<1x16x8xbf16>
    %32 = tpu.concatenate %28, %29, %30, %31 in 0 : vector<1x16x8xbf16>, vector<1x16x8xbf16>, vector<1x16x8xbf16>, vector<1x16x8xbf16> -> vector<4x16x8xbf16>
    %cst_4 = arith.constant dense<0.000000e+00> : vector<4x16x16xf32>
    %33 = tpu.matmul %14, %23, %cst_4 {dimension_numbers = #tpu.dot_dimension_numbers<[2], [2], [1], [1], [0, 0, 0, 1, 1, 1], [0], [0]>} : vector<4x16x8xbf16>, vector<4x16x8xbf16>, vector<4x16x16xf32> -> vector<4x16x16xf32>
    %cst_5 = arith.constant dense<0xFF800000> : vector<4x16xf32>
    %34 = vector.multi_reduction <maximumf>, %33, %cst_5 [2] : vector<4x16x16xf32> to vector<4x16xf32>
    %35 = vector.shape_cast %34 : vector<4x16xf32> to vector<4x16x1xf32>
    %36 = vector.broadcast %35 : vector<4x16x1xf32> to vector<4x16x16xf32>
    %37 = arith.subf %33, %36 : vector<4x16x16xf32>
    %38 = math.exp %37 : vector<4x16x16xf32>
    %cst_6 = arith.constant dense<0.000000e+00> : vector<4x16xf32>
    %39 = vector.multi_reduction <add>, %38, %cst_6 [2] : vector<4x16x16xf32> to vector<4x16xf32>
    %40 = vector.shape_cast %39 : vector<4x16xf32> to vector<4x16x1xf32>
    %41 = arith.truncf %38 : vector<4x16x16xf32> to vector<4x16x16xbf16>
    %cst_7 = arith.constant dense<0.000000e+00> : vector<4x16x8xf32>
    %42 = tpu.matmul %41, %32, %cst_7 {dimension_numbers = #tpu.dot_dimension_numbers<[2], [1], [1], [2], [0, 0, 0, 1, 1, 2], [0], [0]>} : vector<4x16x16xbf16>, vector<4x16x8xbf16>, vector<4x16x8xf32> -> vector<4x16x8xf32>
    %43 = tpu.reciprocal %40 : vector<4x16x1xf32> -> vector<4x16x1xf32>
    %44 = vector.broadcast %43 : vector<4x16x1xf32> to vector<4x16x8xf32>
    %45 = arith.mulf %42, %44 : vector<4x16x8xf32>
    %46 = arith.truncf %45 : vector<4x16x8xf32> to vector<4x16x8xbf16>
    %47 = vector.extract_strided_slice %46 {offsets = [0, 0, 0], sizes = [1, 16, 8], strides = [1, 1, 1]} : vector<4x16x8xbf16> to vector<1x16x8xbf16>
    %48 = vector.shape_cast %47 : vector<1x16x8xbf16> to vector<16x8xbf16>
    %c0_8 = arith.constant 0 : index
    %c0_9 = arith.constant 0 : index
    %49 = vector.load %arg6[%c0_8, %c0_9] : memref<16x32xbf16, #tpu.memory_space<vmem>>, vector<16x8xbf16>
    tpu.vector_store %arg6[%c0_8, %c0_9], %48 {strides = array<i32>} : memref<16x32xbf16, #tpu.memory_space<vmem>>, vector<16x8xbf16>,
    %50 = vector.extract_strided_slice %46 {offsets = [1, 0, 0], sizes = [1, 16, 8], strides = [1, 1, 1]} : vector<4x16x8xbf16> to vector<1x16x8xbf16>
    %51 = vector.shape_cast %50 : vector<1x16x8xbf16> to vector<16x8xbf16>
    %c0_10 = arith.constant 0 : index
    %c8 = arith.constant 8 : index
    %52 = vector.load %arg6[%c0_10, %c8] : memref<16x32xbf16, #tpu.memory_space<vmem>>, vector<16x8xbf16>
    tpu.vector_store %arg6[%c0_10, %c8], %51 {strides = array<i32>} : memref<16x32xbf16, #tpu.memory_space<vmem>>, vector<16x8xbf16>,
    %53 = vector.extract_strided_slice %46 {offsets = [2, 0, 0], sizes = [1, 16, 8], strides = [1, 1, 1]} : vector<4x16x8xbf16> to vector<1x16x8xbf16>
    %54 = vector.shape_cast %53 : vector<1x16x8xbf16> to vector<16x8xbf16>
    %c0_11 = arith.constant 0 : index
    %c16 = arith.constant 16 : index
    %55 = vector.load %arg6[%c0_11, %c16] : memref<16x32xbf16, #tpu.memory_space<vmem>>, vector<16x8xbf16>
    tpu.vector_store %arg6[%c0_11, %c16], %54 {strides = array<i32>} : memref<16x32xbf16, #tpu.memory_space<vmem>>, vector<16x8xbf16>,
    %56 = vector.extract_strided_slice %46 {offsets = [3, 0, 0], sizes = [1, 16, 8], strides = [1, 1, 1]} : vector<4x16x8xbf16> to vector<1x16x8xbf16>
    %57 = vector.shape_cast %56 : vector<1x16x8xbf16> to vector<16x8xbf16>
    %c0_12 = arith.constant 0 : index
    %c24 = arith.constant 24 : index
    %58 = vector.load %arg6[%c0_12, %c24] : memref<16x32xbf16, #tpu.memory_space<vmem>>, vector<16x8xbf16>
    tpu.vector_store %arg6[%c0_12, %c24], %57 {strides = array<i32>} : memref<16x32xbf16, #tpu.memory_space<vmem>>, vector<16x8xbf16>,
    %c0_13 = arith.constant 0 : index
    %c0_14 = arith.constant 0 : index
    %59 = vector.load %arg6[%c0_13, %c0_14] : memref<16x32xbf16, #tpu.memory_space<vmem>>, vector<16x32xbf16>
    %c0_15 = arith.constant 0 : index
    %c0_16 = arith.constant 0 : index
    %60 = vector.load %arg3[%c0_15, %c0_16] : memref<32x32xbf16, #tpu.memory_space<vmem>>, vector<32x32xbf16>
    %cst_17 = arith.constant dense<0.000000e+00> : vector<16x32xf32>
    %61 = tpu.matmul %59, %60, %cst_17 {dimension_numbers = #tpu.dot_dimension_numbers<[1], [0], [0], [1], [0, 0, 1, 1], [], []>} : vector<16x32xbf16>, vector<32x32xbf16>, vector<16x32xf32> -> vector<16x32xf32>
    %c0_18 = arith.constant 0 : index
    %c0_19 = arith.constant 0 : index
    %62 = vector.load %arg4[%c0_18, %c0_19] : memref<1x32xf32, #tpu.memory_space<vmem>>, vector<1x32xf32>
    %63 = vector.broadcast %62 : vector<1x32xf32> to vector<16x32xf32>
    %64 = arith.addf %61, %63 : vector<16x32xf32>
    %65 = vector.shape_cast %64 : vector<16x32xf32> to vector<1x16x32xf32>
    %c0_20 = arith.constant 0 : index
    %c0_21 = arith.constant 0 : index
    %c0_22 = arith.constant 0 : index
    %66 = vector.load %arg5[%c0_20, %c0_21, %c0_22] : memref<1x16x32xf32, #tpu.memory_space<vmem>>, vector<1x16x32xf32>
    tpu.vector_store %arg5[%c0_20, %c0_21, %c0_22], %65 {strides = array<i32>} : memref<1x16x32xf32, #tpu.memory_space<vmem>>, vector<1x16x32xf32>,
    return
  }
  func.func @transform_0(%arg0: i32) -> (i32, i32, i32) {
    %c0_i32 = arith.constant 0 : i32
    %c0_i32_0 = arith.constant 0 : i32
    %c0_i32_1 = arith.constant 0 : i32
    return %arg0, %c0_i32, %c0_i32_0 : i32, i32, i32
  }
  func.func @transform_1(%arg0: i32) -> (i32, i32) {
    %c0_i32 = arith.constant 0 : i32
    %c0_i32_0 = arith.constant 0 : i32
    %c0_i32_1 = arith.constant 0 : i32
    return %c0_i32, %c0_i32_0 : i32, i32
  }
  func.func @transform_2(%arg0: i32) -> (i32, i32) {
    %c0_i32 = arith.constant 0 : i32
    %c0_i32_0 = arith.constant 0 : i32
    %c0_i32_1 = arith.constant 0 : i32
    return %c0_i32, %c0_i32_0 : i32, i32
  }
  func.func @transform_3(%arg0: i32) -> (i32, i32) {
    %c0_i32 = arith.constant 0 : i32
    %c0_i32_0 = arith.constant 0 : i32
    %c0_i32_1 = arith.constant 0 : i32
    return %c0_i32, %c0_i32_0 : i32, i32
  }
  func.func @transform_4(%arg0: i32) -> (i32, i32, i32) {
    %c0_i32 = arith.constant 0 : i32
    %c0_i32_0 = arith.constant 0 : i32
    %c0_i32_1 = arith.constant 0 : i32
    return %arg0, %c0_i32, %c0_i32_0 : i32, i32, i32
  }
}

</mosaic_0001>

<bundles_post_ra>
// kernel: tpu_custom_call.1
= control target key start
LH: loop header
LB: loop body
LE: loop exit
PB: predicated region body
PF: predicated region fallthrough
CT: control target
= control target key end

     0   :  { %9 = vsyncpa [#allocation4], 0  ;;  %s1758_s0 = inlined_call_operand.hbm [shape: f32[2,16,32], index: 0, kind: input, shape index: {}]   ;;  %s1759_s1 = inlined_call_operand.hbm [shape: bf16[32,96], index: 1, kind: input, shape index: {}]   ;;  %s1760_s2 = inlined_call_operand.hbm [shape: bf16[32,32], index: 2, kind: input, shape index: {}]   ;;  %s1761_s3 = inlined_call_operand.vmem [shape: f32[1,32], index: 3, kind: input, shape index: {}]   ;;  %s1762_s4 = inlined_call_operand.hbm [shape: f32[2,16,32], index: 4, kind: output, shape index: {}]  }
   0x1   :  { %11 = vsyncpa [#allocation4 + $0x1], 0 }
   0x2   :  { %12 = vsyncpa [#allocation7], 0 }
   0x3   :  { %13 = vsyncpa [#allocation5], 0 }
   0x4   :  { %15 = vsyncpa [#allocation5 + $0x1], 0  ;;  %s1436_s15 = smov 0   ;;  %s1438_s16 = smov 0  }
   0x5   :  { %s1440_s17 = smov 0   ;;  %s1442_s18 = smov 0  }
   0x6 LB: > { %s1457_s19 = sadd.s32 4294967295, %s1390_s18   ;;  %s995_s20 = sadd.s32 4294967294, %s1390_s18   ;;  %s1390_s18 = sphi %s1442_s18, %s1782_s18   ;;  %s1386_s17 = sphi %s1440_s17, %s1781_s17   ;;  %s1382_s16 = sphi %s1438_s16, %s1780_s16   ;;  %s1378_s15 = sphi %s1436_s15, %s1779_s15  }
   0x7   : > { %p41_p0 = scmp.ne.s32.totalorder %s1382_s16, %s1378_s15  ;;  %p1763_p1 = scmp.eq.s32.totalorder %s1457_s19, 0 }
   0x8   : > { %p134_p3 = scmp.eq.s32.totalorder %s995_s20, 1  ;;  %p996_p5 = scmp.ge.s32.totalorder %s1390_s18, 1 }
   0x9   : > { %p1466_p4 = por %p1763_p1, %p41_p0  ;;  %p141_p7 = scmp.lt.s32.totalorder %s1390_s18, 3 }
   0xa   : > { %p1471_p6 = por %p134_p3, %p41_p0  ;;  %s1392_s24 = smov [#allocation6]  }
   0xb   : > { %s1766_s21 = scalar_select %p1466_p4, 1, 0 }
   0xc   : > { %s1767_s22 = scalar_select %p1471_p6, 1, 0 }
   0xd   : > { %p1476_p8 = pnand %p996_p5, %p141_p7  ;;  %s153_s25 = sshll.u32 %s1392_s24, 4  ;;  %s1480_s25 = int_to_ptr.vmem [resolvable:$true] %s153_s25 }
   0xe   : > { %s1393_s27 = smov [#allocation8]   ;;  %s1234_s5 = scalar_lea.hbm %s1759_s1, 256 }
   0xf   : > { %p1128_p9 = pneg %p1476_p8  ;;  %s166_s28 = sshll.u32 %s1393_s27, 4  ;;  %s1491_s28 = int_to_ptr.vmem [resolvable:$true] %s166_s28 }
  0x10   : > { %p1235_p12 = scmp.ne.s32.totalorder %s1759_s1, %s1234_s5  ;;  %p1241_p5 = scmp.lt.u32.totalorder %s1234_s5, %s1759_s1 }
  0x11   : > { %p1487_p11 = pnand %p1128_p9, %p1763_p1 }
  0x13   : > { %p1236_p13 = pneg %p1487_p11 }
  0x15   : > { %p1237_p0 = pnand %p1236_p13, %p1235_p12 }
  0x17   : > { %p1238_p3 = pneg %p1237_p0 }
  0x19   : > { %p1243_p7 = pnand %p1241_p5, %p1238_p3 }
  0x1b   : > { %1246 = shalt.err (!%p1243_p7)
}
  0x1c   : > { %s1247_s10 = scalar_lea.vmem %s1480_s25, 256  ;;  %p1255_p2 = scmp.lt.s32.totalorder %s1480_s25, %s1480_s25 }
  0x1d   : > { %p1248_p9 = scmp.ne.s32.totalorder %s1480_s25, %s1247_s10  ;;  %p1256_p12 = scmp.lt.s32.totalorder %s1247_s10, %s1247_s10 }
  0x1f   : > { %p1250_p10 = pnand %p1248_p9, %p1236_p13  ;;  %p1257_p0 = por %p1256_p12, %p1255_p2 }
  0x21   : > { %p1251_p1 = pneg %p1250_p10 }
  0x23   : > { %p1258_p6 = pnand %p1257_p0, %p1251_p1 }
  0x25   : > { %1261 = shalt.err (!%p1258_p6)
}
  0x26   : > { %s1394_s11 = smov 64   ;;  %s1395_s12 = smov 4  }
  0x27   : > { %1131 = dma.hbm_to_vmem [thread:$0]  (!%p1487_p11), %s1759_s1, 256, %s1480_s25, [#allocation7], %s1394_s11, %s1394_s11, %s1395_s12  }
  0x28   : > { %s1262_s27 = scalar_lea.hbm %s1760_s2, 256 }
  0x29   : > { %p1263_p2 = scmp.ne.s32.totalorder %s1760_s2, %s1262_s27  ;;  %p1269_p10 = scmp.lt.u32.totalorder %s1262_s27, %s1760_s2 }
  0x2b   : > { %p1265_p1 = pnand %p1263_p2, %p1236_p13 }
  0x2d   : > { %p1266_p6 = pneg %p1265_p1 }
  0x2f   : > { %p1271_p3 = pnand %p1269_p10, %p1266_p6 }
  0x31   : > { %1274 = shalt.err (!%p1271_p3)
}
  0x32   : > { %s1275_s25 = scalar_lea.vmem %s1491_s28, 256  ;;  %p1283_p12 = scmp.lt.s32.totalorder %s1491_s28, %s1491_s28 }
  0x33   : > { %p1276_p5 = scmp.ne.s32.totalorder %s1491_s28, %s1275_s25  ;;  %p1284_p0 = scmp.lt.s32.totalorder %s1275_s25, %s1275_s25 }
  0x35   : > { %p1278_p7 = pnand %p1276_p5, %p1236_p13  ;;  %p1285_p2 = por %p1284_p0, %p1283_p12 }
  0x37   : > { %p1279_p9 = pneg %p1278_p7 }
  0x39   : > { %p1286_p1 = pnand %p1285_p2, %p1279_p9 }
  0x3b   : > { %1289 = shalt.err (!%p1286_p1)
}
  0x3c   : > { %1134 = dma.hbm_to_vmem [thread:$0]  (!%p1487_p11), %s1760_s2, 256, %s1491_s28, [#allocation7], %s1394_s11, %s1394_s11, %s1395_s12  }
  0x3d   : > { %s1546_s9 = sadd.s32 1, %s1390_s18   ;;  %s28_s26 = sadd.s32 1, %s1386_s17 }
  0x3e   : > { %s25_s10 = ssub.s32 %s1390_s18, %s1546_s9  ;;  %p35_p13 = scmp.ne.s32.totalorder %s1386_s17, %s1382_s16 }
  0x3f   : > { %p26_p6 = scmp.eq.s32.totalorder %s25_s10, 0  ;;  %p36_p10 = scmp.eq.s32.totalorder %s1390_s18, 0 }
  0x40   : > { %p1770_p3 = scmp.eq.s32.totalorder %s1457_s19, 1  ;;  %p1145_p7 = scmp.lt.s32.totalorder %s1390_s18, 2 }
  0x41   : > { %s1562_s14 = scalar_select %p26_p6, %s1386_s17, %s28_s26  }
  0x42   : > { %p1556_p5 = por %p1770_p3, %p35_p13  ;;  %p37_p9 = por %p36_p10, %p35_p13 }
  0x43   : > { %s183_s20 = sand.u32 1, %s1386_s17   ;;  %s1028_s28 = sshll.u32 %s1390_s18, 8 }
  0x44   : > { %s1771_s13 = scalar_select %p1556_p5, 1, 0 }
  0x45   : > { %s1000_s24 = sshll.u32 %s183_s20, 4  ;;  %s1569_s27 = scalar_lea.hbm %s1758_s0, %s1028_s28 }
  0x46   : > { %s187_s29 = scalar_lea.vmem [#allocation3], %s1000_s24  ;;  %p1573_p11 = pnand %p1145_p7, %p37_p9 }
  0x47   : > { %s194_s30 = sshll.u32 %s187_s29, 4  ;;  %s1577_s6 = scalar_lea.sflag [#allocation4], %s183_s20  ;;  %s1571_s30 = int_to_ptr.vmem [resolvable:$true] %s194_s30 }
  0x48   : > { %s1290_s25 = scalar_lea.hbm %s1569_s27, 256  ;;  %p1292_p0 = pneg %p1573_p11 }
  0x49   : > { %p1291_p12 = scmp.ne.s32.totalorder %s1569_s27, %s1290_s25  ;;  %s1295_s26 = scalar_lea.hbm %s1758_s0, 512 }
  0x4a   : > { %p1296_p13 = scmp.lt.u32.totalorder %s1569_s27, %s1758_s0  ;;  %p1297_p6 = scmp.lt.u32.totalorder %s1295_s26, %s1290_s25 }
  0x4b   : > { %p1293_p2 = pnand %p1292_p0, %p1291_p12  ;;  %p1299_p3 = scmp.lt.u32.totalorder %s1290_s25, %s1569_s27 }
  0x4c   : > { %p1298_p10 = por %p1297_p6, %p1296_p13 }
  0x4d   : > { %p1294_p1 = pneg %p1293_p2 }
  0x4e   : > { %p1300_p7 = por %p1299_p3, %p1298_p10 }
  0x50   : > { %p1301_p9 = pnand %p1300_p7, %p1294_p1 }
  0x52   : > { %1304 = shalt.err (!%p1301_p9)
}
  0x53   : > { %s1305_s20 = scalar_lea.vmem %s1571_s30, 256  ;;  %s1396_s28 = smov [#allocation3]  }
  0x54   : > { %p1306_p12 = scmp.ne.s32.totalorder %s1571_s30, %s1305_s20  ;;  %s1310_s11 = sshll.u32 %s1396_s28, 4  ;;  %s1311_s11 = int_to_ptr.vmem [resolvable:$false] %s1310_s11 }
  0x55   : > { %s1312_s12 = scalar_lea.vmem %s1311_s11, 512  ;;  %p1313_p4 = scmp.lt.s32.totalorder %s1571_s30, %s1311_s11 }
  0x56   : > { %p1308_p2 = pnand %p1306_p12, %p1292_p0  ;;  %p1314_p13 = scmp.lt.s32.totalorder %s1312_s12, %s1305_s20 }
  0x58   : > { %p1309_p5 = pneg %p1308_p2  ;;  %p1315_p6 = por %p1314_p13, %p1313_p4 }
  0x5a   : > { %p1316_p10 = pnand %p1315_p6, %p1309_p5 }
  0x5c   : > { %1319 = shalt.err (!%p1316_p10)
}
  0x5d   : > { %s1397_s29 = smov 128   ;;  %s1398_s25 = smov 8  }
  0x5e   : > { %1138 = dma.hbm_to_vmem [thread:$0]  (!%p1573_p11), %s1569_s27, 256, %s1571_s30, %s1577_s6, %s1397_s29, %s1397_s29, %s1398_s25  }
  0x5f   : > { %206 = sbr.rel (%p1476_p8) target bundleno = 1524 (0x5f4), region = 36  ;;  %s1608_s7 = sand.u32 (!%p1476_p8), 1, %s1382_s16  }
  0x60   : > { %s1004_s8 = sshll.u32 (!%p1476_p8), %s1608_s7, 4  ;;  %s209_s26 = scalar_lea.sflag (!%p1476_p8), [#allocation4], %s1608_s7 }
  0x61   : > { %s212_s10 = scalar_lea.vmem (!%p1476_p8), [#allocation3], %s1004_s8  ;;  %p1773_p4 = scmp.ne.s32.totalorder (!%p1476_p8), %s1766_s21, 0 }
  0x66   : > { %1365 = dma.done.wait (%p1773_p4), %s209_s26, 256  }
  0x67   : > { %1367 = vsyncadd (%p1773_p4), %s209_s26, 4294967040  ;;  %p1774_p5 = scmp.eq.s32.totalorder %s1457_s19, 0 }
  0x69   : > { %1369 = dma.done.wait (%p1774_p5), [#allocation7], 512   ;;  %p1775_p8 = pmov %p1774_p5 }
  0x6a   : > { %v1399_v0 = vmov 0.0   ;;  %vm1400_vm0 = vmmov 0   ;;  %v1198_v1 = vld [vmem:[#allocation6] sm:$0xff]   ;;  %v1199_v2 = vld [vmem:[#allocation6 + $0x8] sm:$0xff]   ;;  %vm265_vm1 = vcmask 261120   ;;  %s1401_s21 = smov 104  }
  0x6b   : > { %1371 = vsyncadd (%p1775_p8), [#allocation7], 4294966784  ;;  %1052 = vmatprep.subr.bf16.mxu0 %v1399_v0  ;;  %1056 = vmatprep.mubr.msk.bf16.mxu0 %vm1400_vm0, %v1399_v0  ;;  %v246_v3 = vld [vmem:[%s212_s10] sm:$0xff]  ;;  %v247_v4 = vld [vmem:[%s212_s10 + $0x8] sm:$0xff]  ;;  %s1402_s23 = smov 120   ;;  %s1403_s27 = smov 96  }
  0x6c   : > { %1060 = vmatprep.subr.bf16.mxu1 %v1399_v0  ;;  %1062 = vmatprep.mubr.msk.bf16.mxu1 %vm1400_vm0, %v1399_v0  ;;  %v248_v5 = vpack.c.bf16 %v247_v4, %v246_v3  ;;  %s1404_s30 = smov 112   ;;  %vm320_vm2 = vcmask 64512   ;;  %s1405_s5 = smov 64   ;;  %vm515_vm3 = vcmask 130048   ;;  %vm805_vm4 = vcmask 130112  }
  0x6d   : > { %1053 = vmatpush3.bf16.msra.mxu0 %v1198_v1  ;;  %s1406_s6 = smov 8   ;;  %s1407_s24 = smov 16   ;;  %vm811_vm5 = vcmask 195712   ;;  %vm817_vm6 = vcmask 261312  }
  0x6e   : > { %1054 = vmatprep.subr.bf16.mxu0 %v1399_v0  ;;  %s1408_s20 = smov 24   ;;  %s244_s12 = scalar_lea.vmem [#allocation9], %s1004_s8 }
  0x6f   : > { %s903_s29 = sshll.u32 %s244_s12, 4  ;;  %s1029_s25 = sshll.u32 %s1457_s19, 8  ;;  %s1706_s29 = int_to_ptr.vmem [resolvable:$true] %s903_s29 }
  0x70   : > { %s1712_s8 = scalar_lea.hbm %s1762_s4, %s1029_s25  ;;  %s890_s19 = scalar_lea.sflag [#allocation5], %s1608_s7 }
  0x71   : > { %1055 = vmatpush3.bf16.msra.mxu0 %v1199_v2  ;;  %p1776_p0 = scmp.ne.s32.totalorder %s1771_s13, 0 }
  0x72   : > { %1066 = vmatprep.subr.bf16.mxu0 %v1399_v0 }
  0x74   : > { %1057 = vmatmul.mubr.msk.bf16.vlgmr.msra.gmra.mrb[0].mxu0 %vm265_vm1, %v248_v5 }
  0x75   : > { %1068 = vmatprep.mubr.msk.bf16.mxu0 %vm1400_vm0, %v1399_v0 }
 0x147   : > { %v303_v6 = vpop.f32.mrb[0].mxu0 }
 0x148   : > { %v1058_v7 = vpop.f32.mrb[1].mxu0 }
 0x149   : > { %v306_v8 = vpop.f32.mrb[2].mxu0 }
 0x14a   : > { %v310_v9 = vpack.c.bf16 %v306_v8, %v303_v6  ;;  %v1059_v10 = vpop.f32.mrb[3].mxu0 }
 0x14c   : > { %316 = vrot.lane.b32.xlu1 %v310_v9, %s1401_s21  ;;  %312 = vrot.lane.b32.xlu0 %v310_v9, %s1402_s23  ;;  %s1320_s21 = scalar_lea.vmem %s1706_s29, 256  ;;  %s1409_s23 = smov [#allocation9]  }
 0x14d   : > { %p1321_p11 = scmp.ne.s32.totalorder %s1706_s29, %s1320_s21 }
 0x14f   : > { %p1322_p1 = pnand %p1321_p11, %p1776_p0 }
 0x150   : > { %318 = vrot.lane.b32.xlu1 %v310_v9, %s1403_s27  ;;  %314 = vrot.lane.b32.xlu0 %v310_v9, %s1404_s30 }
 0x151   : > { %p1323_p3 = pneg %p1322_p1 }
 0x1be   : > { %v1633_v11 = vpop.permute.xlu1 %316  ;;  %v313_v12 = vpop.permute.xlu0 %312 }
 0x1bf   : > { %368 = vrot.lane.b32.xlu0 %v313_v12, %s1403_s27 }
 0x1c2   : > { %v319_v13 = vpop.permute.xlu1 %318  ;;  %v1635_v14 = vpop.permute.xlu0 %314 }
 0x1c3   : > { %466 = vrot.lane.b32.xlu0 %v1633_v11, %s1403_s27  ;;  %417 = vrot.lane.b32.xlu1 %v1635_v14, %s1403_s27  ;;  %v325_v15 = vsel %vm320_vm2, %v319_v13, 0  ;;  %s1324_s27 = sshll.u32 %s1409_s23, 4  ;;  %s1325_s27 = int_to_ptr.vmem [resolvable:$false] %s1324_s27 }
 0x1c4   : > { %1061 = vmatpush3.bf16.xpose.msra.mxu1 %v325_v15  ;;  %s1326_s30 = scalar_lea.vmem %s1325_s27, 512  ;;  %p1327_p7 = scmp.lt.s32.totalorder %s1706_s29, %s1325_s27 }
 0x1c5   : > { %1072 = vmatprep.subr.bf16.mxu1 %v1399_v0  ;;  %p1328_p9 = scmp.lt.s32.totalorder %s1326_s30, %s1320_s21 }
 0x1c7   : > { %592 = vrot.lane.b32.xlu0 %v310_v9, %s1405_s5  ;;  %639 = vrot.lane.b32.xlu1 %v313_v12, %s1405_s5  ;;  %p1329_p12 = por %p1328_p9, %p1327_p7 }
 0x1c9   : > { %p1330_p2 = pnand %p1329_p12, %p1323_p3 }
 0x1cb   : > { %1063 = vmatmul.mubr.msk.bf16.vlgmr.msra.gmra.mrb[0].mxu1 %vm320_vm2, %v310_v9 }
 0x1cc   : > { %1074 = vmatprep.mubr.msk.bf16.mxu1 %vm1400_vm0, %v1399_v0 }
 0x231   : > { %v369_v16 = vpop.permute.xlu0 %368 }
 0x232   : > { %v374_v17 = vsel %vm320_vm2, %v369_v16, 0 }
 0x233   : > { %1067 = vmatpush3.bf16.xpose.msra.mxu0 %v374_v17 }
 0x234   : > { %1078 = vmatprep.subr.bf16.mxu0 %v1399_v0 }
 0x235   : > { %v418_v18 = vpop.permute.xlu1 %417  ;;  %v467_v20 = vpop.permute.xlu0 %466 }
 0x236   : > { %v423_v19 = vsel %vm320_vm2, %v418_v18, 0  ;;  %v472_v21 = vsel %vm320_vm2, %v467_v20, 0 }
 0x237   : > { %1073 = vmatpush3.bf16.xpose.msra.mxu1 %v423_v19 }
 0x238   : > { %1084 = vmatprep.subr.bf16.mxu1 %v1399_v0 }
 0x239   : > { %v593_v22 = vpop.permute.xlu0 %592  ;;  %v640_v23 = vpop.permute.xlu1 %639 }
 0x23a   : > { %1069 = vmatmul.mubr.msk.bf16.vlgmr.msra.gmra.mrb[4].mxu0 %vm320_vm2, %v313_v12 }
 0x23b   : > { %1079 = vmatpush3.bf16.xpose.msra.mxu0 %v472_v21  ;;  %1080 = vmatprep.mubr.msk.bf16.mxu0 %vm1400_vm0, %v1399_v0 }
 0x23c   : > { %1090 = vmatprep.subr.bf16.mxu0 %v1399_v0 }
 0x23e   : > { %1075 = vmatmul.mubr.msk.bf16.vlgmr.msra.gmra.mrb[4].mxu1 %vm320_vm2, %v1635_v14 }
 0x23f   : > { %1085 = vmatpush3.bf16.msra.mxu1 %v593_v22  ;;  %1086 = vmatprep.mubr.msk.bf16.mxu1 %vm1400_vm0, %v1399_v0 }
 0x240   : > { %1096 = vmatprep.subr.bf16.mxu1 %v1399_v0 }
 0x242   : > { %1081 = vmatmul.mubr.msk.bf16.vlgmr.msra.gmra.mrb[8].mxu0 %vm320_vm2, %v1633_v11 }
 0x243   : > { %1091 = vmatpush3.bf16.msra.mxu0 %v640_v23  ;;  %1092 = vmatprep.mubr.msk.bf16.mxu0 %vm1400_vm0, %v1399_v0 }
 0x244   : > { %1102 = vmatprep.subr.bf16.mxu0 %v1399_v0 }
 0x29e   : > { %v361_v24 = vpop.f32.mrb[0].mxu1 }
 0x29f   : > { %v1064_v25 = vpop.f32.mrb[1].mxu1  ;;  %v516_v26 = vsel %vm515_vm3, %v361_v24, -inf }
 0x2a0   : > { %v364_v27 = vpop.f32.mrb[2].mxu1  ;;  %517 = vmax.xlane.f32.xlu1 %v516_v26 }
 0x2a1   : > { %v1065_v28 = vpop.f32.mrb[3].mxu1  ;;  %v519_v29 = vsel %vm515_vm3, %v364_v27, -inf }
 0x2a2   : > { %520 = vmax.xlane.f32.xlu0 %v519_v29 }
 0x30d   : > { %v410_v30 = vpop.f32.mrb[4].mxu0 }
 0x30e   : > { %v1070_v31 = vpop.f32.mrb[5].mxu0  ;;  %v522_v32 = vsel %vm515_vm3, %v410_v30, -inf }
 0x30f   : > { %523 = vmax.xlane.f32.xlu0 %v522_v32  ;;  %v413_v33 = vpop.f32.mrb[6].mxu0 }
 0x310   : > { %v1071_v34 = vpop.f32.mrb[7].mxu0  ;;  %v525_v35 = vsel %vm515_vm3, %v413_v33, -inf }
 0x311   : > { %v459_v36 = vpop.f32.mrb[4].mxu1  ;;  %526 = vmax.xlane.f32.xlu1 %v525_v35 }
 0x312   : > { %v1076_v37 = vpop.f32.mrb[5].mxu1  ;;  %v528_v38 = vsel %vm515_vm3, %v459_v36, -inf }
 0x313   : > { %v462_v39 = vpop.f32.mrb[6].mxu1  ;;  %529 = vmax.xlane.f32.xlu0 %v528_v38 }
 0x314   : > { %v1077_v40 = vpop.f32.mrb[7].mxu1  ;;  %v531_v41 = vsel %vm515_vm3, %v462_v39, -inf }
 0x315   : > { %532 = vmax.xlane.f32.xlu1 %v531_v41  ;;  %v508_v42 = vpop.f32.mrb[8].mxu0 }
 0x316   : > { %v1082_v43 = vpop.f32.mrb[9].mxu0  ;;  %v534_v44 = vsel %vm515_vm3, %v508_v42, -inf }
 0x317   : > { %535 = vmax.xlane.f32.xlu0 %v534_v44  ;;  %v511_v45 = vpop.f32.mrb[10].mxu0 }
 0x318   : > { %v1083_v46 = vpop.f32.mrb[11].mxu0  ;;  %v537_v47 = vsel %vm515_vm3, %v511_v45, -inf }
 0x319   : > { %538 = vmax.xlane.f32.xlu1 %v537_v47 }
 0x32a   : > { %686 = vrot.lane.b32.xlu1 %v1635_v14, %s1405_s5 }
 0x32d   : > { %v518_v48 = vpop.xlane.xlu1 %517  ;;  %733 = vrot.lane.b32.xlu0 %v1633_v11, %s1405_s5 }
 0x32e   : > { %v540_v49 = vsub.f32 %v361_v24, %v518_v48 }
 0x32f   : > { %v521_v50 = vpop.xlane.xlu0 %520 }
 0x330   : > { %v548_v51 = vmul.f32 1.442695, %v540_v49  ;;  %v541_v52 = vsub.f32 %v364_v27, %v521_v50 }
 0x332   : > { %v550_v53 = vmul.f32 1.442695, %v541_v52  ;;  %1202 = vpow2.f32 %v548_v51 }
 0x334   : > { %1204 = vpow2.f32 %v550_v53  ;;  %v1200_v53 = vld [vmem:[#allocation8] sm:$0xff]  }
 0x33c   : > { %v1203_v54 = vpop.eup %1202 }
 0x33e   : > { %v1205_v55 = vpop.eup %1204 }
 0x33f   : > { %v588_v56 = vpack.c.bf16 %v1205_v55, %v1203_v54  ;;  %v567_v29 = vsel %vm515_vm3, %v1205_v55, 0.0 }
 0x341   : > { %1087 = vmatmul.mubr.msk.bf16.vlgmr.msra.gmra.mrb[8].mxu1 %vm515_vm3, %v588_v56 }
 0x342   : > { %1098 = vmatprep.mubr.msk.bf16.mxu1 %vm1400_vm0, %v1399_v0 }
 0x39c   : > { %v524_v57 = vpop.xlane.xlu0 %523 }
 0x39d   : > { %v542_v58 = vsub.f32 %v410_v30, %v524_v57  ;;  %v564_v30 = vsel %vm515_vm3, %v1203_v54, 0.0 }
 0x39e   : > { %v527_v59 = vpop.xlane.xlu1 %526 }
 0x39f   : > { %v552_v60 = vmul.f32 1.442695, %v542_v58  ;;  %v543_v61 = vsub.f32 %v413_v33, %v527_v59  ;;  %v1201_v59 = vld [vmem:[#allocation8 + $0x8] sm:$0xff]  }
 0x3a0   : > { %v530_v62 = vpop.xlane.xlu0 %529 }
 0x3a1   : > { %1206 = vpow2.f32 %v552_v60  ;;  %v554_v63 = vmul.f32 1.442695, %v543_v61  ;;  %v544_v1 = vsub.f32 %v459_v36, %v530_v62 }
 0x3a2   : > { %v533_v2 = vpop.xlane.xlu1 %532 }
 0x3a3   : > { %1208 = vpow2.f32 %v554_v63  ;;  %v556_v3 = vmul.f32 1.442695, %v544_v1  ;;  %v545_v4 = vsub.f32 %v462_v39, %v533_v2 }
 0x3a4   : > { %v536_v5 = vpop.xlane.xlu0 %535 }
 0x3a5   : > { %1210 = vpow2.f32 %v556_v3  ;;  %v558_v6 = vmul.f32 1.442695, %v545_v4  ;;  %v546_v7 = vsub.f32 %v508_v42, %v536_v5 }
 0x3a6   : > { %v539_v8 = vpop.xlane.xlu1 %538 }
 0x3a7   : > { %1212 = vpow2.f32 %v558_v6  ;;  %v560_v9 = vmul.f32 1.442695, %v546_v7  ;;  %v547_v10 = vsub.f32 %v511_v45, %v539_v8 }
 0x3a8   : > { %v734_v18 = vpop.permute.xlu0 %733 }
 0x3a9   : > { %v562_v11 = vmul.f32 1.442695, %v547_v10  ;;  %1214 = vpow2.f32 %v560_v9 }
 0x3aa   : > { %v687_v12 = vpop.permute.xlu1 %686 }
 0x3ab   : > { %v1207_v13 = vpop.eup %1206  ;;  %1216 = vpow2.f32 %v562_v11  ;;  %1097 = vmatpush3.bf16.msra.mxu1 %v687_v12 }
 0x3ac   : > { %v570_v14 = vsel %vm515_vm3, %v1207_v13, 0.0  ;;  %1108 = vmatprep.subr.bf16.mxu1 %v1399_v0 }
 0x3ad   : > { %v1209_v15 = vpop.eup %1208  ;;  %571 = vadd.xlane.f32.xlu1 %v570_v14 }
 0x3ae   : > { %v589_v16 = vpack.c.bf16 %v1209_v15, %v1207_v13  ;;  %v573_v24 = vsel %vm515_vm3, %v1209_v15, 0.0 }
 0x3af   : > { %v1211_v17 = vpop.eup %1210 }
 0x3b0   : > { %1093 = vmatmul.mubr.msk.bf16.vlgmr.msra.gmra.mrb[12].mxu0 %vm515_vm3, %v589_v16  ;;  %v576_v19 = vsel %vm515_vm3, %v1211_v17, 0.0 }
 0x3b1   : > { %v1213_v20 = vpop.eup %1212  ;;  %1103 = vmatpush3.bf16.msra.mxu0 %v734_v18  ;;  %577 = vadd.xlane.f32.xlu0 %v576_v19 }
 0x3b2   : > { %v579_v21 = vsel %vm515_vm3, %v1213_v20, 0.0  ;;  %v590_v22 = vpack.c.bf16 %v1213_v20, %v1211_v17  ;;  %1104 = vmatprep.mubr.msk.bf16.mxu0 %vm1400_vm0, %v1399_v0  ;;  %v1019_v17 = vld [vmem:[%s1761_s3] ss:$0 sm:$0xff] }
 0x3b3   : > { %580 = vadd.xlane.f32.xlu1 %v579_v21  ;;  %v1215_v23 = vpop.eup %1214 }
 0x3b4   : > { %1099 = vmatmul.mubr.msk.bf16.vlgmr.msra.gmra.mrb[12].mxu1 %vm515_vm3, %v590_v22  ;;  %v582_v28 = vsel %vm515_vm3, %v1215_v23, 0.0 }
 0x3b5   : > { %v1217_v25 = vpop.eup %1216  ;;  %574 = vadd.xlane.f32.xlu0 %v573_v24  ;;  %1112 = vmatprep.mubr.msk.bf16.mxu1 %vm1400_vm0, %v1399_v0 }
 0x3b6   : > { %v585_v26 = vsel %vm515_vm3, %v1217_v25, 0.0  ;;  %v591_v27 = vpack.c.bf16 %v1217_v25, %v1215_v23  ;;  %1109 = vmatpush3.bf16.msra.mxu1 %v1200_v53 }
 0x3b7   : > { %586 = vadd.xlane.f32.xlu1 %v585_v26  ;;  %1110 = vmatprep.subr.bf16.mxu1 %v1399_v0 }
 0x3b8   : > { %1105 = vmatmul.mubr.msk.bf16.vlgmr.msra.gmra.mrb[16].mxu0 %vm515_vm3, %v591_v27 }
 0x3b9   : > { %583 = vadd.xlane.f32.xlu0 %v582_v28 }
 0x3ba   : > { %1111 = vmatpush3.bf16.msra.mxu1 %v1201_v59 }
 0x3bb   : > { %568 = vadd.xlane.f32.xlu1 %v567_v29 }
 0x3bd   : > { %565 = vadd.xlane.f32.xlu0 %v564_v30 }
 0x414   : > { %v632_v31 = vpop.f32.mrb[8].mxu1 }
 0x415   : > { %v1088_v32 = vpop.f32.mrb[9].mxu1 }
 0x416   : > { %v635_v33 = vpop.f32.mrb[10].mxu1 }
 0x417   : > { %v1089_v34 = vpop.f32.mrb[11].mxu1 }
 0x43a   : > { %v572_v35 = vpop.xlane.xlu1 %571 }
 0x43e   : > { %v578_v36 = vpop.xlane.xlu0 %577 }
 0x440   : > { %v581_v37 = vpop.xlane.xlu1 %580 }
 0x442   : > { %v575_v38 = vpop.xlane.xlu0 %574 }
 0x444   : > { %v587_v39 = vpop.xlane.xlu1 %586 }
 0x446   : > { %v584_v40 = vpop.xlane.xlu0 %583 }
 0x448   : > { %v569_v41 = vpop.xlane.xlu1 %568 }
 0x449   : > { %1218 = vrcp.f32 %v569_v41 }
 0x44a   : > { %v566_v42 = vpop.xlane.xlu0 %565 }
 0x44b   : > { %1220 = vrcp.f32 %v566_v42 }
 0x44c   : > { %1222 = vrcp.f32 %v572_v35 }
 0x44d   : > { %1224 = vrcp.f32 %v575_v38 }
 0x44e   : > { %1226 = vrcp.f32 %v578_v36 }
 0x44f   : > { %1228 = vrcp.f32 %v581_v37 }
 0x450   : > { %1230 = vrcp.f32 %v587_v39 }
 0x451   : > { %1232 = vrcp.f32 %v584_v40 }
 0x453   : > { %v1219_v43 = vpop.eup %1218 }
 0x454   : > { %v789_v45 = vmul.f32 %v1219_v43, %v635_v33 }
 0x455   : > { %v1221_v44 = vpop.eup %1220 }
 0x456   : > { %v788_v46 = vmul.f32 %v1221_v44, %v632_v31  ;;  %v1223_v49 = vpop.eup %1222 }
 0x457   : > { %v1225_v51 = vpop.eup %1224 }
 0x458   : > { %v796_v47 = vpack.c.bf16 %v789_v45, %v788_v46  ;;  %v1227_v57 = vpop.eup %1226 }
 0x459   : > { %v1229_v63 = vpop.eup %1228 }
 0x45a   : > { %800 = vst.msk [vmem:[#allocation2] sm:$0xff] %vm320_vm2, %v796_v47  ;;  %v1231_v5 = vpop.eup %1230 }
 0x45b   : > { %v1233_v8 = vpop.eup %1232 }
 0x483   : > { %v679_v48 = vpop.f32.mrb[12].mxu0 }
 0x484   : > { %v1094_v50 = vpop.f32.mrb[13].mxu0  ;;  %v790_v54 = vmul.f32 %v1223_v49, %v679_v48 }
 0x485   : > { %v682_v52 = vpop.f32.mrb[14].mxu0 }
 0x486   : > { %v791_v55 = vmul.f32 %v1225_v51, %v682_v52  ;;  %v1095_v56 = vpop.f32.mrb[15].mxu0 }
 0x487   : > { %v726_v58 = vpop.f32.mrb[12].mxu1 }
 0x488   : > { %v797_v60 = vpack.c.bf16 %v791_v55, %v790_v54  ;;  %v792_v61 = vmul.f32 %v1227_v57, %v726_v58  ;;  %v1100_v62 = vpop.f32.mrb[13].mxu1 }
 0x489   : > { %v729_v1 = vpop.f32.mrb[14].mxu1 }
 0x48a   : > { %v793_v2 = vmul.f32 %v1229_v63, %v729_v1  ;;  %v1101_v3 = vpop.f32.mrb[15].mxu1  ;;  %802 = vrot.lane.b32.xlu0 %v797_v60, %s1406_s6 }
 0x48b   : > { %v773_v4 = vpop.f32.mrb[16].mxu0 }
 0x48c   : > { %v798_v6 = vpack.c.bf16 %v793_v2, %v792_v61  ;;  %v1106_v7 = vpop.f32.mrb[17].mxu0  ;;  %v794_v10 = vmul.f32 %v1233_v8, %v773_v4 }
 0x48d   : > { %v776_v9 = vpop.f32.mrb[18].mxu0 }
 0x48e   : > { %v795_v11 = vmul.f32 %v1231_v5, %v776_v9  ;;  %808 = vrot.lane.b32.xlu1 %v798_v6, %s1407_s24  ;;  %v1107_v12 = vpop.f32.mrb[19].mxu0 }
 0x490   : > { %v799_v0 = vpack.c.bf16 %v795_v11, %v794_v10 }
 0x492   : > { %814 = vrot.lane.b32.xlu1 %v799_v0, %s1408_s20 }
 0x4fc   : > { %v803_v13 = vpop.permute.xlu0 %802 }
 0x4fd   : > { %806 = vst.msk [vmem:[#allocation2] sm:$0xff] %vm805_vm4, %v803_v13 }
 0x500   : > { %v809_v14 = vpop.permute.xlu1 %808 }
 0x501   : > { %812 = vst.msk [vmem:[#allocation2] sm:$0xff] %vm811_vm5, %v809_v14 }
 0x504   : > { %v815_v15 = vpop.permute.xlu1 %814 }
 0x505   : > { %818 = vst.msk [vmem:[#allocation2] sm:$0xff] %vm817_vm6, %v815_v15 }
 0x50c   : > { %v819_v16 = vld [vmem:[#allocation2] sm:$0xff] }
 0x50d   : > { %1113 = vmatmul.mubr.msk.bf16.vlgmr.msra.gmra.mrb[16].mxu1 %vm265_vm1, %v819_v16 }
 0x5e0   : > { %v880_v18 = vpop.f32.mrb[16].mxu1 }
 0x5e1   : > { %v881_v19 = vadd.f32 %v1019_v17, %v880_v18  ;;  %v1114_v20 = vpop.f32.mrb[17].mxu1 }
 0x5e2   : > { %v883_v21 = vpop.f32.mrb[18].mxu1 }
 0x5e3   : > { %887 = vst.msk [vmem:[%s244_s12] sm:$0xff] %vm265_vm1, %v881_v19  ;;  %v884_v22 = vadd.f32 %v1019_v17, %v883_v21  ;;  %v1115_v23 = vpop.f32.mrb[19].mxu1 }
 0x5e5   : > { %888 = vst.msk [vmem:[%s244_s12 + $0x8] sm:$0xff] %vm265_vm1, %v884_v22 }
 0x5e6   : > { %1333 = shalt.err (!%p1330_p2)
}
 0x5e7   : > { %s1334_s5 = scalar_lea.hbm %s1712_s8, 256  ;;  %s1338_s28 = scalar_lea.hbm %s1762_s4, 512 }
 0x5e8   : > { %p1335_p13 = scmp.ne.s32.totalorder %s1712_s8, %s1334_s5  ;;  %p1339_p4 = scmp.lt.u32.totalorder %s1712_s8, %s1762_s4 }
 0x5e9   : > { %p1340_p5 = scmp.lt.u32.totalorder %s1338_s28, %s1334_s5  ;;  %p1342_p11 = scmp.lt.u32.totalorder %s1334_s5, %s1712_s8 }
 0x5ea   : > { %p1336_p6 = pnand %p1335_p13, %p1776_p0 }
 0x5eb   : > { %p1341_p8 = por %p1340_p5, %p1339_p4 }
 0x5ec   : > { %p1337_p10 = pneg %p1336_p6 }
 0x5ed   : > { %p1343_p1 = por %p1342_p11, %p1341_p8 }
 0x5ef   : > { %p1344_p3 = pnand %p1343_p1, %p1337_p10 }
 0x5f1   : > { %1347 = shalt.err (!%p1344_p3)
}
 0x5f2   : > { %s1410_s25 = smov 128  }
 0x5f3   : > { %1126 = dma.vmem_to_hbm [thread:$0]  (%p1776_p0), %s1706_s29, 256, %s1712_s8, %s890_s19, %s1410_s25, %s1410_s25, %s1406_s6  }
 0x5f4 PF: > { %s918_s26 = sand.u32 1, %s1378_s15   ;;  %p1777_p7 = scmp.ne.s32.totalorder %s1767_s22, 0 }
 0x5f5   : > { %p1778_p9 = scmp.ge.s32.totalorder %s1390_s18, 2  ;;  %s919_s10 = scalar_lea.sflag [#allocation5], %s918_s26 }
 0x5f7   : > { %p1140_p12 = pnand %p1778_p9, %p1777_p7 }
 0x5f9   : > { %1373 = dma.done.wait (!%p1140_p12), %s919_s10, 256  }
 0x5fa   : > { %1375 = vsyncadd (!%p1140_p12), %s919_s10, 4294967040  ;;  %p18_p2 = scmp.ge.s32.totalorder %s1546_s9, 4   ;;  %s1779_s15 = smov %s1382_s16 }
 0x5fb   : > { %s1780_s16 = smov %s1386_s17  ;;  %s1781_s17 = smov %s1562_s14 }
 0x5fc   : > { %s1782_s18 = smov %s1546_s9  ;;  %20 = sbr.rel (!%p18_p2) target bundleno = 6 (0x6), region = 89 }
 0x603   :  { %924 = vsyncpa [#allocation4], 1 }
 0x604   :  { %926 = vsyncpa [#allocation4 + $0x1], 1 }
 0x605   :  { %927 = vsyncpa [#allocation7], 1 }
 0x606   :  { %928 = vsyncpa [#allocation5], 1 }
 0x607   :  { %930 = vsyncpa [#allocation5 + $0x1], 1 }

</bundles_post_ra>
